<compile_context>
chip_gen: v7x
topology: tpu7x:2x2x1
jax: 0.10.0
libtpu: 0.0.40
codegen_flags: <defaults>
</compile_context>

<pallas_src>
import functools

import jax
import jax.numpy as jnp
from jax.experimental import pallas as pl
from jax.experimental.pallas import tpu as pltpu


def _sni_kernel(x_ref, g_ref, o_ref, *, n_chunks, x_scale):
    """One MXU matmul per block: (TR, W) @ (W, W*f^2) -> (TR, W*f^2).

    x_ref: (TR, W)      input rows (one image row per block row)
    g_ref: (W, W*f^2)   resident bf16 one-hot replication matrix (alpha
                        folded in when it is exactly representable in bf16)
    o_ref: (TR, W*f^2)  output rows; contiguous view of (..., H*f, W*f)
    """
    g = g_ref[...]
    if n_chunks == 1:
        # Native single-pass bf16 matmul.
        x = x_ref[...]
        if x_scale != 1.0:
            x = (x.astype(jnp.float32) * jnp.float32(x_scale)).astype(g.dtype)
        else:
            x = x.astype(g.dtype)
        y = jnp.dot(x, g, preferred_element_type=jnp.float32)
    else:
        # Exact wide-float path: split x into n_chunks bf16 pieces and do one
        # single-pass bf16 matmul per piece.  Each G column has exactly one
        # nonzero (a power of two or 1.0), so the f32-accumulated sum
        # reconstructs alpha*x to full precision with n_chunks=3.
        rem = x_ref[...].astype(jnp.float32)
        if x_scale != 1.0:
            rem = rem * jnp.float32(x_scale)
        c = rem.astype(jnp.bfloat16)
        y = jnp.dot(c, g, preferred_element_type=jnp.float32)
        for _ in range(n_chunks - 1):
            rem = rem - c.astype(jnp.float32)
            c = rem.astype(jnp.bfloat16)
            y = y + jnp.dot(c, g, preferred_element_type=jnp.float32)
    o_ref[...] = y.astype(o_ref.dtype)


def _round_down(x: int, m: int) -> int:
    return (x // m) * m


def _block_target_bytes() -> int:
    """~4 MiB output blocks; ~8 MiB on v7x-class chips (small VMEM, fast HBM)."""
    try:
        info = pltpu.get_tpu_info()
        if getattr(info, "vmem_capacity_bytes", 128 << 20) <= (64 << 20):
            return 8 * 1024 * 1024
    except Exception:
        pass
    return 4 * 1024 * 1024


def _pick_rows(total_rows: int, out_row_bytes: int, sublane: int) -> int:
    """Rows per block: big enough to amortize per-step overhead, >=2 steps."""
    if total_rows <= sublane:
        return total_rows                       # single full-extent block
    tr = max(1, _block_target_bytes() // max(1, out_row_bytes))
    tr = min(tr, -(-total_rows // 2))           # keep grid >= 2 (two v7x TCs)
    tr = max(sublane, _round_down(tr, sublane))
    return tr


def sni(x, up_f: int = 2):
    """x: (N, C, H, W) -> (N, C, H*up_f, W*up_f), scaled by 1/up_f**2."""
    n, c, h, w = x.shape
    f = up_f
    hf, wf = h * f, w * f
    wf2 = w * f * f
    alpha = 1.0 / (f * f)
    rows = n * c * h
    dt = jnp.dtype(x.dtype)
    itemsize = dt.itemsize

    # Fold alpha into the bf16 G only when it is exactly representable there
    # (power-of-two up_f); otherwise scale the small pre-upsample tile in f32.
    pow2 = (f & (f - 1)) == 0
    g_scale = alpha if pow2 else 1.0
    x_scale = 1.0 if pow2 else alpha

    if dt == jnp.dtype(jnp.bfloat16):
        n_chunks, sublane = 1, 16      # single native bf16 MXU pass
    elif dt == jnp.dtype(jnp.float16):
        n_chunks, sublane = 2, 16      # 10-bit mantissa -> 2 bf16 chunks
    else:
        n_chunks, sublane = 3, 8       # f32 (and default): 3 bf16 chunks

    # Constant (W, W*f^2) replication matrix: column (rh*Wf + w*f + rw) is
    # fed by input column w, independent of rh and rw.
    cols = jnp.arange(wf2)
    src = (cols % wf) // f
    g = jnp.where(src[None, :] == jnp.arange(w)[:, None],
                  jnp.float32(g_scale), jnp.float32(0.0)).astype(jnp.bfloat16)

    tr = _pick_rows(rows, wf2 * itemsize, sublane)
    grid = (pl.cdiv(rows, tr),)

    x2d = x.reshape(rows, w)           # free contiguous view

    kernel = functools.partial(_sni_kernel, n_chunks=n_chunks, x_scale=x_scale)

    cost = pl.CostEstimate(
        flops=2 * rows * w * wf2 * n_chunks,
        transcendentals=0,
        bytes_accessed=rows * (w + wf2) * itemsize,
    )

    out2d = pl.pallas_call(
        kernel,
        out_shape=jax.ShapeDtypeStruct((rows, wf2), x.dtype),
        grid_spec=pltpu.PrefetchScalarGridSpec(
            num_scalar_prefetch=0,
            grid=grid,
            in_specs=[
                pl.BlockSpec((tr, w), lambda i: (i, 0)),
                pl.BlockSpec((w, wf2), lambda i: (0, 0)),   # resident G
            ],
            out_specs=pl.BlockSpec((tr, wf2), lambda i: (i, 0)),
        ),
        compiler_params=pltpu.CompilerParams(
            dimension_semantics=("parallel",)),
        cost_estimate=cost,
    )(x2d, g)

    # (rows, W*f^2) row-major is exactly the contiguous (N, C, Hf, Wf)
    # nearest-neighbor layout -> free reshape, no extra HBM traffic.
    return out2d.reshape(n, c, hf, wf)


def _sni_ref(x, up_f=2):
    alpha = 1.0 / (up_f ** 2)
    y = jnp.repeat(jnp.repeat(x, up_f, axis=2), up_f, axis=3)
    return alpha * y


if __name__ == "__main__":
    key = jax.random.PRNGKey(0)
    # SNI has no learnable parameters (alpha is a fixed scalar = 1/up_f^2).
    x = jax.random.normal(key, (2, 4, 16, 16), dtype=jnp.float32)

    out = jax.block_until_ready(sni(x, up_f=2))

    ref = _sni_ref(x, up_f=2)
    assert out.shape == (2, 4, 32, 32), out.shape
    assert jnp.allclose(out, ref, atol=1e-5, rtol=1e-5), (
        float(jnp.max(jnp.abs(out - ref))))

    print("KERNEL_OK")
</pallas_src>

<mosaic_0001>
module attributes {stable_mosaic.version = 11 : i64} {
  func.func @_sni_kernel(%arg0: i32, %arg1: memref<64x16xf32, #tpu.memory_space<vmem>>, %arg2: memref<16x64xbf16, #tpu.memory_space<vmem>>, %arg3: memref<64x64xf32, #tpu.memory_space<vmem>>) attributes {dimension_semantics = [#tpu.dimension_semantics<parallel>], iteration_bounds = array<i64: 2>, scalar_prefetch = 0 : i64, scratch_operands = 0 : i64, tpu.core_type = #tpu.core_type<tc>, window_params = [{transform_indices = @transform_0, window_bounds = array<i64: 64, 16>}, {pipeline_mode = #tpu.pipeline_mode<synchronous>, transform_indices = @transform_1, window_bounds = array<i64: 16, 64>}, {transform_indices = @transform_2, window_bounds = array<i64: 64, 64>}]} {
    %c0 = arith.constant 0 : index
    %c0_0 = arith.constant 0 : index
    %0 = vector.load %arg2[%c0, %c0_0] : memref<16x64xbf16, #tpu.memory_space<vmem>>, vector<16x64xbf16>
    %c0_1 = arith.constant 0 : index
    %c0_2 = arith.constant 0 : index
    %1 = vector.load %arg1[%c0_1, %c0_2] : memref<64x16xf32, #tpu.memory_space<vmem>>, vector<64x16xf32>
    %2 = arith.truncf %1 : vector<64x16xf32> to vector<64x16xbf16>
    %cst = arith.constant dense<0.000000e+00> : vector<64x64xf32>
    %3 = tpu.matmul %2, %0, %cst {dimension_numbers = #tpu.dot_dimension_numbers<[1], [0], [0], [1], [0, 0, 1, 1], [], []>} : vector<64x16xbf16>, vector<16x64xbf16>, vector<64x64xf32> -> vector<64x64xf32>
    %4 = arith.extf %2 : vector<64x16xbf16> to vector<64x16xf32>
    %5 = arith.subf %1, %4 : vector<64x16xf32>
    %6 = arith.truncf %5 : vector<64x16xf32> to vector<64x16xbf16>
    %cst_3 = arith.constant dense<0.000000e+00> : vector<64x64xf32>
    %7 = tpu.matmul %6, %0, %cst_3 {dimension_numbers = #tpu.dot_dimension_numbers<[1], [0], [0], [1], [0, 0, 1, 1], [], []>} : vector<64x16xbf16>, vector<16x64xbf16>, vector<64x64xf32> -> vector<64x64xf32>
    %8 = arith.addf %3, %7 : vector<64x64xf32>
    %9 = arith.extf %6 : vector<64x16xbf16> to vector<64x16xf32>
    %10 = arith.subf %5, %9 : vector<64x16xf32>
    %11 = arith.truncf %10 : vector<64x16xf32> to vector<64x16xbf16>
    %cst_4 = arith.constant dense<0.000000e+00> : vector<64x64xf32>
    %12 = tpu.matmul %11, %0, %cst_4 {dimension_numbers = #tpu.dot_dimension_numbers<[1], [0], [0], [1], [0, 0, 1, 1], [], []>} : vector<64x16xbf16>, vector<16x64xbf16>, vector<64x64xf32> -> vector<64x64xf32>
    %13 = arith.addf %8, %12 : vector<64x64xf32>
    %c0_5 = arith.constant 0 : index
    %c0_6 = arith.constant 0 : index
    %14 = vector.load %arg3[%c0_5, %c0_6] : memref<64x64xf32, #tpu.memory_space<vmem>>, vector<64x64xf32>
    tpu.vector_store %arg3[%c0_5, %c0_6], %13 {strides = array<i32>} : memref<64x64xf32, #tpu.memory_space<vmem>>, vector<64x64xf32>,
    return
  }
  func.func @transform_0(%arg0: i32) -> (i32, i32) {
    %c0_i32 = arith.constant 0 : i32
    %c0_i32_0 = arith.constant 0 : i32
    return %arg0, %c0_i32 : i32, i32
  }
  func.func @transform_1(%arg0: i32) -> (i32, i32) {
    %c0_i32 = arith.constant 0 : i32
    %c0_i32_0 = arith.constant 0 : i32
    %c0_i32_1 = arith.constant 0 : i32
    return %c0_i32, %c0_i32_0 : i32, i32
  }
  func.func @transform_2(%arg0: i32) -> (i32, i32) {
    %c0_i32 = arith.constant 0 : i32
    %c0_i32_0 = arith.constant 0 : i32
    return %arg0, %c0_i32 : i32, i32
  }
}

</mosaic_0001>

<bundles_post_ra>
// kernel: tpu_custom_call.1
= control target key start
LH: loop header
LB: loop body
LE: loop exit
PB: predicated region body
PF: predicated region fallthrough
CT: control target
= control target key end

     0   :  { %s632_s9 = smov 0   ;;  %s679_s0 = inlined_call_operand.vmem [shape: f32[128,16], index: 0, kind: input, shape index: {}]   ;;  %s680_s1 = inlined_call_operand.vmem [shape: bf16[16,64], index: 1, kind: input, shape index: {}]   ;;  %s681_s2 = inlined_call_operand.vmem [shape: f32[128,64], index: 2, kind: output, shape index: {}]  }
   0x1 LB: > { %s513_s10 = sadd.s32 4294967295, %s615_s9   ;;  %p517_p0 = scmp.ge.s32.totalorder %s615_s9, 1  ;;  %s615_s9 = sphi %s632_s9, %s12_s9  }
   0x2   : > { %p113_p1 = scmp.lt.s32.totalorder %s615_s9, 3 }
   0x4   : > { %p114_p2 = pnand %p517_p0, %p113_p1 }
   0x5   : > { %v608_v0 = vld [vmem:[%s680_s1] sm:$0xff] (!%p114_p2)   ;;  %s518_s13 = sshll.u32 (!%p114_p2), %s513_s10, 3  ;;  %vm188_vm0 = vcmask (!%p114_p2), 130048   ;;  %vm448_vm1 = vcmask (!%p114_p2), 523264  }
   0x6   : > { %117 = sbr.rel (%p114_p2) target bundleno = 264 (0x108), region = 28  ;;  %p136_p3 = scmp.lt.s32.totalorder (!%p114_p2), %s518_s13, 15  ;;  %562 = vmatprep.subr.bf16.mxu0 (!%p114_p2), %v608_v0  ;;  %552 = vmatprep.subr.bf16.mxu1 (!%p114_p2), %v608_v0 }
   0x7   : > { %563 = vmatpush3.bf16.msra.mxu0 (!%p114_p2), %v608_v0  ;;  %553 = vmatpush3.bf16.msra.mxu1 (!%p114_p2), %v608_v0 }
   0x8   : > { %582 = vmatprep.subr.bf16.mxu1 (!%p114_p2), %v608_v0  ;;  %572 = vmatprep.subr.bf16.mxu0 (!%p114_p2), %v608_v0 }
   0xd   : > { %s683_s13 = smov (!%p136_p3, %s518_s13), 15 }
   0xe   : > { %s519_s14 = sshll.u32 %s683_s13, 3 }
   0xf   : > { %s139_s17 = scalar_lea.vmem %s679_s0, %s519_s14  ;;  %s145_s20 = scalar_lea.vmem %s681_s2, %s519_s14 }
  0x10   : > { %v150_v1 = vld [vmem:[%s139_s17] sm:$0xff]  ;;  %v151_v2 = vld [vmem:[%s139_s17 + $0x8] sm:$0xff]  ;;  %v152_v3 = vld [vmem:[%s139_s17 + $0x10] sm:$0xff] }
  0x11   : > { %v158_v4 = vpack.c.bf16 %v151_v2, %v150_v1  ;;  %v153_v5 = vld [vmem:[%s139_s17 + $0x18] sm:$0xff]  ;;  %v154_v6 = vld [vmem:[%s139_s17 + $0x20] sm:$0xff]  ;;  %v155_v7 = vld [vmem:[%s139_s17 + $0x28] sm:$0xff] }
  0x12   : > { %v159_v8 = vpack.c.bf16 %v153_v5, %v152_v3  ;;  %v160_v9 = vpack.c.bf16 %v155_v7, %v154_v6  ;;  %v156_v10 = vld [vmem:[%s139_s17 + $0x30] sm:$0xff]  ;;  %v157_v11 = vld [vmem:[%s139_s17 + $0x38] sm:$0xff] }
  0x13   : > { %564 = vmatprep.mubr.msk.bf16.mxu0 %vm188_vm0, %v158_v4  ;;  %v162_v12 = vunpack.c.l.bf16 %v158_v4  ;;  %v163_v13 = vunpack.c.h.bf16 %v158_v4  ;;  %v161_v14 = vpack.c.bf16 %v157_v11, %v156_v10 }
  0x14   : > { %565 = vmatmul.mubr.msk.bf16.vlgmr.msra.gmra.mrb[0].mxu0 %vm188_vm0, %v159_v8  ;;  %v164_v15 = vunpack.c.l.bf16 %v159_v8  ;;  %v165_v16 = vunpack.c.h.bf16 %v159_v8  ;;  %v166_v17 = vunpack.c.l.bf16 %v160_v9  ;;  %v167_v18 = vunpack.c.h.bf16 %v160_v9 }
  0x15   : > { %v170_v19 = vsub.f32 %v150_v1, %v162_v12  ;;  %v171_v20 = vsub.f32 %v151_v2, %v163_v13  ;;  %573 = vmatpush3.bf16.msra.mxu0 %v608_v0  ;;  %v168_v21 = vunpack.c.l.bf16 %v161_v14  ;;  %v169_v22 = vunpack.c.h.bf16 %v161_v14 }
  0x16   : > { %v172_v23 = vsub.f32 %v152_v3, %v164_v15  ;;  %v173_v24 = vsub.f32 %v153_v5, %v165_v16  ;;  %v174_v25 = vsub.f32 %v154_v6, %v166_v17  ;;  %v175_v26 = vsub.f32 %v155_v7, %v167_v18 }
  0x17   : > { %v178_v27 = vpack.c.bf16 %v171_v20, %v170_v19  ;;  %v176_v28 = vsub.f32 %v156_v10, %v168_v21  ;;  %v177_v29 = vsub.f32 %v157_v11, %v169_v22 }
  0x18   : > { %v179_v30 = vpack.c.bf16 %v173_v24, %v172_v23  ;;  %v180_v31 = vpack.c.bf16 %v175_v26, %v174_v25 }
  0x19   : > { %554 = vmatprep.mubr.msk.bf16.mxu1 %vm188_vm0, %v178_v27  ;;  %v343_v32 = vunpack.c.l.bf16 %v178_v27  ;;  %v344_v33 = vunpack.c.h.bf16 %v178_v27  ;;  %v181_v34 = vpack.c.bf16 %v177_v29, %v176_v28 }
  0x1a   : > { %555 = vmatmul.mubr.msk.bf16.vlgmr.msra.gmra.mrb[0].mxu1 %vm188_vm0, %v179_v30  ;;  %v345_v35 = vunpack.c.l.bf16 %v179_v30  ;;  %v346_v36 = vunpack.c.h.bf16 %v179_v30  ;;  %v347_v37 = vunpack.c.l.bf16 %v180_v31  ;;  %v348_v38 = vunpack.c.h.bf16 %v180_v31 }
  0x1b   : > { %v351_v39 = vsub.f32 %v170_v19, %v343_v32  ;;  %v352_v40 = vsub.f32 %v171_v20, %v344_v33  ;;  %583 = vmatpush3.bf16.msra.mxu1 %v608_v0  ;;  %558 = vmatprep.mubr.msk.bf16.mxu1 %vm188_vm0, %v180_v31  ;;  %v349_v41 = vunpack.c.l.bf16 %v181_v34  ;;  %v350_v42 = vunpack.c.h.bf16 %v181_v34 }
  0x1c   : > { %v353_v43 = vsub.f32 %v172_v23, %v345_v35  ;;  %v354_v44 = vsub.f32 %v173_v24, %v346_v36  ;;  %v355_v45 = vsub.f32 %v174_v25, %v347_v37  ;;  %v356_v46 = vsub.f32 %v175_v26, %v348_v38 }
  0x1d   : > { %v359_v47 = vpack.c.bf16 %v352_v40, %v351_v39  ;;  %v357_v50 = vsub.f32 %v176_v28, %v349_v41  ;;  %v358_v51 = vsub.f32 %v177_v29, %v350_v42 }
  0x1e   : > { %v360_v48 = vpack.c.bf16 %v354_v44, %v353_v43  ;;  %v361_v49 = vpack.c.bf16 %v356_v46, %v355_v45 }
  0x1f   : > { %574 = vmatprep.mubr.msk.bf16.mxu0 %vm188_vm0, %v359_v47  ;;  %v362_v52 = vpack.c.bf16 %v358_v51, %v357_v50 }
  0x20   : > { %575 = vmatmul.mubr.msk.bf16.vlgmr.msra.gmra.mrb[0].mxu0 %vm188_vm0, %v360_v48 }
  0x21   : > { %578 = vmatprep.mubr.msk.bf16.mxu0 %vm188_vm0, %v361_v49 }
  0x22   : > { %559 = vmatmul.mubr.msk.bf16.gmra.mrb[4].mxu1 %vm188_vm0, %v181_v34 }
  0x23   : > { %568 = vmatprep.mubr.msk.bf16.mxu1 %vm188_vm0, %v160_v9 }
  0x28   : > { %579 = vmatmul.mubr.msk.bf16.gmra.mrb[4].mxu0 %vm188_vm0, %v362_v52 }
  0x2e   : > { %569 = vmatmul.mubr.msk.bf16.vlgmr.msra.gmra.mrb[4].mxu1 %vm188_vm0, %v161_v14 }
  0xed   : > { %v556_v53 = vpop.f32.mrb[0].mxu1 }
  0xee   : > { %v235_v54 = vpop.f32.mrb[1].mxu1 }
  0xef   : > { %v557_v55 = vpop.f32.mrb[2].mxu1 }
  0xf0   : > { %v238_v56 = vpop.f32.mrb[3].mxu1 }
  0xf3   : > { %v576_v57 = vpop.f32.mrb[0].mxu0 }
  0xf4   : > { %v584_v58 = vadd.f32 %v576_v57, %v556_v53  ;;  %v409_v59 = vpop.f32.mrb[1].mxu0 }
  0xf5   : > { %v585_v60 = vadd.f32 %v409_v59, %v235_v54  ;;  %v577_v61 = vpop.f32.mrb[2].mxu0 }
  0xf6   : > { %451 = vst.msk [vmem:[%s145_s20 + $0x10] sm:$0xff] %vm448_vm1, %v584_v58  ;;  %v586_v62 = vadd.f32 %v577_v61, %v557_v55  ;;  %v412_v63 = vpop.f32.mrb[3].mxu0 }
  0xf7   : > { %449 = vst.msk [vmem:[%s145_s20] sm:$0xff] %vm448_vm1, %v585_v60  ;;  %v587_v0 = vadd.f32 %v412_v63, %v238_v56 }
  0xf8   : > { %452 = vst.msk [vmem:[%s145_s20 + $0x18] sm:$0xff] %vm448_vm1, %v586_v62 }
  0xf9   : > { %450 = vst.msk [vmem:[%s145_s20 + $0x8] sm:$0xff] %vm448_vm1, %v587_v0 }
  0xfb   : > { %v580_v1 = vpop.f32.mrb[4].mxu0 }
  0xfc   : > { %v425_v2 = vpop.f32.mrb[5].mxu0 }
  0xfd   : > { %v581_v3 = vpop.f32.mrb[6].mxu0 }
  0xfe   : > { %v428_v4 = vpop.f32.mrb[7].mxu0 }
 0x101   : > { %v570_v5 = vpop.f32.mrb[4].mxu1 }
 0x102   : > { %v588_v6 = vadd.f32 %v580_v1, %v570_v5  ;;  %v328_v7 = vpop.f32.mrb[5].mxu1 }
 0x103   : > { %v589_v8 = vadd.f32 %v425_v2, %v328_v7  ;;  %v571_v9 = vpop.f32.mrb[6].mxu1 }
 0x104   : > { %455 = vst.msk [vmem:[%s145_s20 + $0x30] sm:$0xff] %vm448_vm1, %v588_v6  ;;  %v590_v10 = vadd.f32 %v581_v3, %v571_v9  ;;  %v331_v11 = vpop.f32.mrb[7].mxu1 }
 0x105   : > { %453 = vst.msk [vmem:[%s145_s20 + $0x20] sm:$0xff] %vm448_vm1, %v589_v8  ;;  %v591_v12 = vadd.f32 %v428_v4, %v331_v11 }
 0x106   : > { %456 = vst.msk [vmem:[%s145_s20 + $0x38] sm:$0xff] %vm448_vm1, %v590_v10 }
 0x107   : > { %454 = vst.msk [vmem:[%s145_s20 + $0x28] sm:$0xff] %vm448_vm1, %v591_v12 }
 0x108 PF: > { %s12_s9 = sadd.s32 1, %s615_s9  }
 0x109   : > { %p9_p4 = scmp.ge.s32.totalorder %s12_s9, 4  }
 0x10b   :  { %11 = sbr.rel (!%p9_p4) target bundleno = 1 (0x1), region = 58 }

</bundles_post_ra>
